<compile_context>
chip_gen: v7x
topology: tpu7x:2x2x1
jax: 0.10.0
libtpu: 0.0.40
codegen_flags: <defaults>
</compile_context>

<pallas_src>
import math

import jax
import jax.numpy as jnp
from jax import lax
from jax.experimental import pallas as pl
from jax.experimental.pallas import tpu as pltpu


def _linear_lora_kernel(x_ref, w_ref, b_ref, xa_ref, bs_ref, o_ref, acc_ref):
    # x_ref:  (tm, tk)      input row tile (K slice)
    # w_ref:  (tk, tn)      pre-transposed linear weight tile (in_dim, out_dim)
    # b_ref:  (1,  tn)      bias tile (f32)
    # xa_ref: (tm, r_pad)   precomputed LoRA down-projection x @ A (rank padded)
    # bs_ref: (r_pad, tn)   alpha-folded LoRA B tile (rank padded)
    # o_ref:  (tm, tn)      output tile
    # acc_ref:(tm, tn) f32  accumulator (persists across k)
    k = pl.program_id(2)
    nk = pl.num_programs(2)

    @pl.when(k == 0)
    def _init():
        # Fold bias + LoRA up-projection into the accumulator init; the K loop
        # below only has to add the base-path partial products.
        acc_ref[...] = b_ref[...] + jnp.dot(
            xa_ref[...], bs_ref[...], preferred_element_type=jnp.float32)

    # Base path on the MXU: x_tile @ W^T_tile (W stored (in_dim, out_dim)).
    acc_ref[...] += jnp.dot(x_ref[...], w_ref[...],
                            preferred_element_type=jnp.float32)

    @pl.when(k == nk - 1)
    def _finalize():
        o_ref[...] = acc_ref[...].astype(o_ref.dtype)


def _round_up(v, m):
    return -(-v // m) * m


def _pick_tile_and_pad(dim, candidates=(512, 256, 128)):
    """Choose a lane-dense tile from `candidates` minimizing zero-padding,
    preferring the largest tile on ties. Returns (tile, padded_dim)."""
    opts = [(_round_up(dim, c), -c) for c in candidates]
    padded, neg_c = min(opts)
    return -neg_c, padded


def linear_with_lora(x, w, b, A, B, alpha, *, tm=None, compute_dtype=None):
    """x: (..., in_dim) -> (..., out_dim); matches nn.Linear + LoRALayer."""
    orig_dtype = x.dtype
    in_dim = x.shape[-1]
    out_dim, w_in = w.shape
    assert w_in == in_dim
    rank = A.shape[1]
    lead_shape = x.shape[:-1]

    x2 = x.reshape(-1, in_dim)
    M = x2.shape[0]

    cdt = jnp.dtype(compute_dtype) if compute_dtype is not None else jnp.dtype(x.dtype)
    cbytes = cdt.itemsize
    pack = max(8, 8 * (4 // cbytes))          # sublane packing: 8 f32 / 16 bf16

    # --- Hoisted LoRA down-projection + alpha folding (wrapper-side) --------
    # M*K*r FLOPs + one extra read of x: negligible vs streaming W.
    xa = jnp.dot(x2.astype(jnp.float32), A.astype(jnp.float32),
                 precision=lax.Precision.HIGHEST)
    bs = jnp.float32(alpha) * B.astype(jnp.float32)

    # --- Pad LoRA rank to full 128-lane vregs --------------------------------
    r_pad = max(128, _round_up(rank, 128))
    xa = jnp.pad(xa, ((0, 0), (0, r_pad - rank)))
    bs = jnp.pad(bs, ((0, r_pad - rank), (0, 0)))

    # --- Lane-dense N / K tiles with minimal zero-padding --------------------
    tk, k_pad = _pick_tile_and_pad(in_dim)
    tn, n_pad = _pick_tile_and_pad(out_dim)

    # --- Row tile: cover all of M in one pass when it fits VMEM --------------
    tm_cap = 1024 if cbytes <= 2 else 512
    m_round = _round_up(M, pack)
    if tm is None:
        tm_eff = m_round if m_round <= tm_cap else tm_cap
    else:
        tm_eff = _round_up(max(pack, min(tm, m_round)), pack)
    m_pad = _round_up(M, tm_eff)

    # --- Pad / transpose / cast operands -------------------------------------
    x2 = jnp.pad(x2, ((0, m_pad - M), (0, k_pad - in_dim))).astype(cdt)
    wt = jnp.pad(w.T, ((0, k_pad - in_dim), (0, n_pad - out_dim))).astype(cdt)
    xa = jnp.pad(xa, ((0, m_pad - M), (0, 0))).astype(cdt)
    bs = bs.astype(cdt)
    bs = jnp.pad(bs, ((0, 0), (0, n_pad - out_dim)))
    bias2 = jnp.pad(b.astype(jnp.float32).reshape(1, -1),
                    ((0, 0), (0, n_pad - out_dim)))

    grid = (m_pad // tm_eff, n_pad // tn, k_pad // tk)

    # --- Chip-aware VMEM budget ----------------------------------------------
    obytes = jnp.dtype(orig_dtype).itemsize
    needed = (2 * cbytes * (tm_eff * tk + tk * tn + tm_eff * r_pad + r_pad * tn)
              + 2 * 4 * tn                         # bias tile (f32)
              + 2 * obytes * tm_eff * tn           # output tile
              + 4 * tm_eff * tn)                   # f32 accumulator scratch
    try:
        chip_vmem = int(pltpu.get_tpu_info().vmem_capacity_bytes)
    except Exception:
        chip_vmem = 64 * 2**20                     # conservative (v7x per-TC)
    vmem_cap = max(32 * 2**20, min(chip_vmem - 12 * 2**20, 100 * 2**20))
    vmem_limit = int(min(vmem_cap, max(32 * 2**20, 2 * needed)))

    out = pl.pallas_call(
        _linear_lora_kernel,
        out_shape=jax.ShapeDtypeStruct((m_pad, n_pad), orig_dtype),
        grid_spec=pltpu.PrefetchScalarGridSpec(
            num_scalar_prefetch=0,
            grid=grid,
            in_specs=[
                pl.BlockSpec((tm_eff, tk), lambda i, j, k: (i, k)),   # x rows
                pl.BlockSpec((tk, tn), lambda i, j, k: (k, j)),       # W^T
                pl.BlockSpec((1, tn), lambda i, j, k: (0, j)),        # bias
                pl.BlockSpec((tm_eff, r_pad), lambda i, j, k: (i, 0)),  # x @ A
                pl.BlockSpec((r_pad, tn), lambda i, j, k: (0, j)),    # alpha*B
            ],
            out_specs=pl.BlockSpec((tm_eff, tn), lambda i, j, k: (i, j)),
            scratch_shapes=[
                pltpu.VMEM((tm_eff, tn), jnp.float32),   # base+LoRA accumulator
            ],
        ),
        compiler_params=pltpu.CompilerParams(
            # xa is precomputed, so M and N are both independent across tiles:
            # v7x megacore can split W by output columns (no duplicated W
            # reads). K is the reduction axis -> "arbitrary".
            dimension_semantics=("parallel", "parallel", "arbitrary"),
            vmem_limit_bytes=vmem_limit,
        ),
    )(x2, wt, bias2, xa, bs)

    out = out[:M, :out_dim]
    return out.reshape(*lead_shape, out_dim)


def _reference(x, W, b, A, B, alpha):
    hp = lax.Precision.HIGHEST
    base = jnp.einsum("...i,oi->...o", x, W, precision=hp) + b
    xa = jnp.einsum("...i,ir->...r", x, A, precision=hp)
    lora = alpha * jnp.einsum("...r,ro->...o", xa, B, precision=hp)
    return base + lora


def _make_inputs(key, batch, seq, in_dim, out_dim, rank):
    k1, k2, k3, k4, k5 = jax.random.split(key, 5)
    bound = 1.0 / math.sqrt(in_dim)
    x = jax.random.normal(k1, (batch, seq, in_dim), jnp.float32)
    W = jax.random.uniform(k2, (out_dim, in_dim), jnp.float32, -bound, bound)
    b = jax.random.uniform(k3, (out_dim,), jnp.float32, -bound, bound)
    A = jax.random.uniform(k4, (in_dim, rank), jnp.float32, -bound, bound)
    # The module initializes LoRA-B to zeros; use a small nonzero B here so the
    # LoRA path is actually exercised by the correctness check.
    B = 0.05 * jax.random.normal(k5, (rank, out_dim), jnp.float32)
    return x, W, b, A, B


if __name__ == "__main__":
    key = jax.random.PRNGKey(0)
    key1, key2 = jax.random.split(key)

    # --- Test 1: small shapes matching the module's toy usage ---------------
    batch, seq, in_dim, out_dim, rank, alpha = 2, 8, 32, 64, 8, 16.0
    x, W, b, A, B = _make_inputs(key1, batch, seq, in_dim, out_dim, rank)
    y = jax.block_until_ready(linear_with_lora(x, W, b, A, B, alpha))
    ref = _reference(x, W, b, A, B, alpha)
    assert y.shape == (batch, seq, out_dim)
    assert jnp.allclose(y, ref, atol=2e-2, rtol=2e-2), "small-shape mismatch"

    # --- Test 2: shapes exercising M/N/K tiling + N/K zero-padding ----------
    batch, seq, in_dim, out_dim, rank, alpha = 4, 96, 768, 640, 16, 8.0
    x, W, b, A, B = _make_inputs(key2, batch, seq, in_dim, out_dim, rank)
    y = jax.block_until_ready(linear_with_lora(x, W, b, A, B, alpha))
    ref = _reference(x, W, b, A, B, alpha)
    assert y.shape == (batch, seq, out_dim)
    assert jnp.allclose(y, ref, atol=2e-2, rtol=2e-2), "tiled-shape mismatch"

    # --- Test 3: bf16 operands with f32 accumulation (v6e/v7x fast path) ----
    y_bf16 = jax.block_until_ready(
        linear_with_lora(x, W, b, A, B, alpha, compute_dtype=jnp.bfloat16))
    assert jnp.allclose(y_bf16, ref, atol=1.5e-1, rtol=1.5e-1), "bf16 mismatch"

    print("KERNEL_OK")
</pallas_src>

<mosaic_0001>
module attributes {stable_mosaic.version = 11 : i64} {
  func.func @_linear_lora_kernel(%arg0: i32, %arg1: i32, %arg2: i32, %arg3: memref<16x128xf32, #tpu.memory_space<vmem>>, %arg4: memref<128x128xf32, #tpu.memory_space<vmem>>, %arg5: memref<1x128xf32, #tpu.memory_space<vmem>>, %arg6: memref<16x128xf32, #tpu.memory_space<vmem>>, %arg7: memref<128x128xf32, #tpu.memory_space<vmem>>, %arg8: memref<16x128xf32, #tpu.memory_space<vmem>>, %arg9: memref<16x128xf32, #tpu.memory_space<vmem>>) attributes {dimension_semantics = [#tpu.dimension_semantics<parallel>, #tpu.dimension_semantics<parallel>, #tpu.dimension_semantics<arbitrary>], iteration_bounds = array<i64: 1, 1, 1>, scalar_prefetch = 0 : i64, scratch_operands = 1 : i64, tpu.core_type = #tpu.core_type<tc>, window_params = [{transform_indices = @transform_0, window_bounds = array<i64: 16, 128>}, {transform_indices = @transform_1, window_bounds = array<i64: 128, 128>}, {transform_indices = @transform_2, window_bounds = array<i64: 1, 128>}, {transform_indices = @transform_3, window_bounds = array<i64: 16, 128>}, {transform_indices = @transform_4, window_bounds = array<i64: 128, 128>}, {transform_indices = @transform_5, window_bounds = array<i64: 16, 128>}]} {
    %c0_i32 = arith.constant 0 : i32
    %0 = arith.cmpi eq, %arg2, %c0_i32 : i32
    %1 = arith.extui %0 : i1 to i32
    %c0_i32_0 = arith.constant 0 : i32
    %2 = arith.cmpi ne, %1, %c0_i32_0 : i32
    scf.if %2 {
      %c0_10 = arith.constant 0 : index
      %c0_11 = arith.constant 0 : index
      %12 = vector.load %arg5[%c0_10, %c0_11] : memref<1x128xf32, #tpu.memory_space<vmem>>, vector<1x128xf32>
      %c0_12 = arith.constant 0 : index
      %c0_13 = arith.constant 0 : index
      %13 = vector.load %arg6[%c0_12, %c0_13] : memref<16x128xf32, #tpu.memory_space<vmem>>, vector<16x128xf32>
      %c0_14 = arith.constant 0 : index
      %c0_15 = arith.constant 0 : index
      %14 = vector.load %arg7[%c0_14, %c0_15] : memref<128x128xf32, #tpu.memory_space<vmem>>, vector<128x128xf32>
      %cst_16 = arith.constant dense<0.000000e+00> : vector<16x128xf32>
      %15 = tpu.matmul %13, %14, %cst_16 {dimension_numbers = #tpu.dot_dimension_numbers<[1], [0], [0], [1], [0, 0, 1, 1], [], []>} : vector<16x128xf32>, vector<128x128xf32>, vector<16x128xf32> -> vector<16x128xf32>
      %16 = vector.broadcast %12 : vector<1x128xf32> to vector<16x128xf32>
      %17 = arith.addf %16, %15 : vector<16x128xf32>
      %c0_17 = arith.constant 0 : index
      %c0_18 = arith.constant 0 : index
      %18 = vector.load %arg9[%c0_17, %c0_18] : memref<16x128xf32, #tpu.memory_space<vmem>>, vector<16x128xf32>
      tpu.vector_store %arg9[%c0_17, %c0_18], %17 {strides = array<i32>} : memref<16x128xf32, #tpu.memory_space<vmem>>, vector<16x128xf32>,
    } else {
    }
    %c0 = arith.constant 0 : index
    %c0_1 = arith.constant 0 : index
    %3 = vector.load %arg9[%c0, %c0_1] : memref<16x128xf32, #tpu.memory_space<vmem>>, vector<16x128xf32>
    %c0_2 = arith.constant 0 : index
    %c0_3 = arith.constant 0 : index
    %4 = vector.load %arg3[%c0_2, %c0_3] : memref<16x128xf32, #tpu.memory_space<vmem>>, vector<16x128xf32>
    %c0_4 = arith.constant 0 : index
    %c0_5 = arith.constant 0 : index
    %5 = vector.load %arg4[%c0_4, %c0_5] : memref<128x128xf32, #tpu.memory_space<vmem>>, vector<128x128xf32>
    %cst = arith.constant dense<0.000000e+00> : vector<16x128xf32>
    %6 = tpu.matmul %4, %5, %cst {dimension_numbers = #tpu.dot_dimension_numbers<[1], [0], [0], [1], [0, 0, 1, 1], [], []>} : vector<16x128xf32>, vector<128x128xf32>, vector<16x128xf32> -> vector<16x128xf32>
    %7 = arith.addf %3, %6 : vector<16x128xf32>
    %c0_6 = arith.constant 0 : index
    %c0_7 = arith.constant 0 : index
    %8 = vector.load %arg9[%c0_6, %c0_7] : memref<16x128xf32, #tpu.memory_space<vmem>>, vector<16x128xf32>
    tpu.vector_store %arg9[%c0_6, %c0_7], %7 {strides = array<i32>} : memref<16x128xf32, #tpu.memory_space<vmem>>, vector<16x128xf32>,
    %c0_i32_8 = arith.constant 0 : i32
    %9 = arith.cmpi eq, %arg2, %c0_i32_8 : i32
    %10 = arith.extui %9 : i1 to i32
    %c0_i32_9 = arith.constant 0 : i32
    %11 = arith.cmpi ne, %10, %c0_i32_9 : i32
    scf.if %11 {
      %c0_10 = arith.constant 0 : index
      %c0_11 = arith.constant 0 : index
      %12 = vector.load %arg9[%c0_10, %c0_11] : memref<16x128xf32, #tpu.memory_space<vmem>>, vector<16x128xf32>
      %c0_12 = arith.constant 0 : index
      %c0_13 = arith.constant 0 : index
      %13 = vector.load %arg8[%c0_12, %c0_13] : memref<16x128xf32, #tpu.memory_space<vmem>>, vector<16x128xf32>
      tpu.vector_store %arg8[%c0_12, %c0_13], %12 {strides = array<i32>} : memref<16x128xf32, #tpu.memory_space<vmem>>, vector<16x128xf32>,
    } else {
    }
    return
  }
  func.func @transform_0(%arg0: i32, %arg1: i32, %arg2: i32) -> (i32, i32) {
    %c0_i32 = arith.constant 0 : i32
    return %arg0, %arg2 : i32, i32
  }
  func.func @transform_1(%arg0: i32, %arg1: i32, %arg2: i32) -> (i32, i32) {
    %c0_i32 = arith.constant 0 : i32
    return %arg2, %arg1 : i32, i32
  }
  func.func @transform_2(%arg0: i32, %arg1: i32, %arg2: i32) -> (i32, i32) {
    %c0_i32 = arith.constant 0 : i32
    %c0_i32_0 = arith.constant 0 : i32
    return %c0_i32, %arg1 : i32, i32
  }
  func.func @transform_3(%arg0: i32, %arg1: i32, %arg2: i32) -> (i32, i32) {
    %c0_i32 = arith.constant 0 : i32
    %c0_i32_0 = arith.constant 0 : i32
    return %arg0, %c0_i32 : i32, i32
  }
  func.func @transform_4(%arg0: i32, %arg1: i32, %arg2: i32) -> (i32, i32) {
    %c0_i32 = arith.constant 0 : i32
    %c0_i32_0 = arith.constant 0 : i32
    return %c0_i32, %arg1 : i32, i32
  }
  func.func @transform_5(%arg0: i32, %arg1: i32, %arg2: i32) -> (i32, i32) {
    %c0_i32 = arith.constant 0 : i32
    return %arg0, %arg1 : i32, i32
  }
}

</mosaic_0001>

<bundles_post_ra>
// kernel: tpu_custom_call.1
= control target key start
LH: loop header
LB: loop body
LE: loop exit
PB: predicated region body
PF: predicated region fallthrough
CT: control target
= control target key end

     0   :  { %10 = vsyncpa [#allocation4], 0  ;;  %s738_s0 = inlined_call_operand.hbm [shape: f32[16,128], index: 0, kind: input, shape index: {}]   ;;  %s739_s1 = inlined_call_operand.hbm [shape: f32[128,128], index: 1, kind: input, shape index: {}]   ;;  %s740_s2 = inlined_call_operand.vmem [shape: f32[1,128], index: 2, kind: input, shape index: {}]   ;;  %s741_s3 = inlined_call_operand.hbm [shape: f32[16,128], index: 3, kind: input, shape index: {}]   ;;  %s742_s4 = inlined_call_operand.hbm [shape: f32[128,128], index: 4, kind: input, shape index: {}]   ;;  %s743_s5 = inlined_call_operand.hbm [shape: f32[16,128], index: 5, kind: output, shape index: {}]  }
   0x1   :  { %11 = vsyncpa [#allocation7], 0 }
   0x2   :  { %12 = vsyncpa [#allocation10], 0 }
   0x3   :  { %13 = vsyncpa [#allocation5], 0  ;;  %s609_s18 = smov [#allocation6]   ;;  %s610_s20 = smov [#allocation3]  }
   0x4   :  { %s31_s19 = sshll.u32 %s609_s18, 4  ;;  %s19_s21 = sshll.u32 %s610_s20, 4  ;;  %s32_s19 = int_to_ptr.vmem [resolvable:$true] %s31_s19  ;;  %s646_s21 = int_to_ptr.vmem [resolvable:$true] %s19_s21 }
   0x5   :  { %s491_s24 = scalar_lea.hbm %s739_s1, 2048 }
   0x6   :  { %p492_p0 = scmp.ne.s32.totalorder %s739_s1, %s491_s24  ;;  %p495_p1 = scmp.lt.u32.totalorder %s491_s24, %s739_s1 }
   0x8   :  { %p497_p2 = pnand %p495_p1, %p492_p0 }
   0xa   :  { %500 = shalt.err (!%p497_p2)
}
   0xb   :  { %s501_s29 = scalar_lea.vmem %s32_s19, 2048  ;;  %p506_p4 = scmp.lt.s32.totalorder %s32_s19, %s32_s19 }
   0xc   :  { %p502_p3 = scmp.ne.s32.totalorder %s32_s19, %s501_s29  ;;  %p507_p5 = scmp.lt.s32.totalorder %s501_s29, %s501_s29 }
   0xe   :  { %p508_p6 = por %p507_p5, %p506_p4 }
  0x10   :  { %p509_p7 = pnand %p508_p6, %p502_p3 }
  0x12   :  { %512 = shalt.err (!%p509_p7)
}
  0x13   :  { %s611_s30 = smov 128   ;;  %s612_s6 = smov 8  }
  0x14   :  { %37 = dma.hbm_to_vmem [thread:$0]  %s739_s1, 2048, %s32_s19, [#allocation7], %s611_s30, %s611_s30, %s612_s6  }
  0x15   :  { %s513_s11 = scalar_lea.hbm %s738_s0, 256 }
  0x16   :  { %p514_p8 = scmp.ne.s32.totalorder %s738_s0, %s513_s11  ;;  %p517_p9 = scmp.lt.u32.totalorder %s513_s11, %s738_s0 }
  0x18   :  { %p519_p10 = pnand %p517_p9, %p514_p8 }
  0x1a   :  { %522 = shalt.err (!%p519_p10)
}
  0x1b   :  { %s523_s16 = scalar_lea.vmem %s646_s21, 256  ;;  %p528_p12 = scmp.lt.s32.totalorder %s646_s21, %s646_s21 }
  0x1c   :  { %p524_p11 = scmp.ne.s32.totalorder %s646_s21, %s523_s16  ;;  %p529_p13 = scmp.lt.s32.totalorder %s523_s16, %s523_s16 }
  0x1e   :  { %p530_p0 = por %p529_p13, %p528_p12 }
  0x20   :  { %p531_p1 = pnand %p530_p0, %p524_p11 }
  0x22   :  { %534 = shalt.err (!%p531_p1)
}
  0x23   :  { %25 = dma.hbm_to_vmem [thread:$0]  %s738_s0, 256, %s646_s21, [#allocation4], %s611_s30, %s611_s30, %s612_s6  }
  0x24   :  { %s613_s18 = smov [#allocation8]   ;;  %s614_s20 = smov [#allocation9]  }
  0x25   :  { %s45_s19 = sshll.u32 %s613_s18, 4  ;;  %s57_s22 = sshll.u32 %s614_s20, 4  ;;  %s46_s19 = int_to_ptr.vmem [resolvable:$true] %s45_s19  ;;  %s683_s22 = int_to_ptr.vmem [resolvable:$true] %s57_s22 }
  0x26   :  { %s535_s25 = scalar_lea.hbm %s741_s3, 256 }
  0x27   :  { %p536_p2 = scmp.ne.s32.totalorder %s741_s3, %s535_s25  ;;  %p539_p3 = scmp.lt.u32.totalorder %s535_s25, %s741_s3 }
  0x29   :  { %p541_p4 = pnand %p539_p3, %p536_p2 }
  0x2b   :  { %544 = shalt.err (!%p541_p4)
}
  0x2c   :  { %s545_s0 = scalar_lea.vmem %s46_s19, 256  ;;  %p550_p6 = scmp.lt.s32.totalorder %s46_s19, %s46_s19 }
  0x2d   :  { %p546_p5 = scmp.ne.s32.totalorder %s46_s19, %s545_s0  ;;  %p551_p7 = scmp.lt.s32.totalorder %s545_s0, %s545_s0 }
  0x2f   :  { %p552_p8 = por %p551_p7, %p550_p6 }
  0x31   :  { %p553_p9 = pnand %p552_p8, %p546_p5 }
  0x33   :  { %556 = shalt.err (!%p553_p9)
}
  0x34   :  { %51 = dma.hbm_to_vmem [thread:$0]  %s741_s3, 256, %s46_s19, [#allocation7], %s611_s30, %s611_s30, %s612_s6  }
  0x35   :  { %s557_s10 = scalar_lea.hbm %s742_s4, 2048 }
  0x36   :  { %p558_p10 = scmp.ne.s32.totalorder %s742_s4, %s557_s10  ;;  %p561_p11 = scmp.lt.u32.totalorder %s557_s10, %s742_s4 }
  0x38   :  { %p563_p12 = pnand %p561_p11, %p558_p10 }
  0x3a   :  { %566 = shalt.err (!%p563_p12)
}
  0x3b   :  { %s567_s15 = scalar_lea.vmem %s683_s22, 2048  ;;  %p572_p0 = scmp.lt.s32.totalorder %s683_s22, %s683_s22 }
  0x3c   :  { %p568_p13 = scmp.ne.s32.totalorder %s683_s22, %s567_s15  ;;  %p573_p1 = scmp.lt.s32.totalorder %s567_s15, %s567_s15 }
  0x3e   :  { %p574_p2 = por %p573_p1, %p572_p0 }
  0x40   :  { %p575_p3 = pnand %p574_p2, %p568_p13 }
  0x42   :  { %578 = shalt.err (!%p575_p3)
}
  0x43   :  { %63 = dma.hbm_to_vmem [thread:$0]  %s742_s4, 2048, %s683_s22, [#allocation10], %s611_s30, %s611_s30, %s612_s6  }
  0x44   :  { %601 = dma.done.wait [#allocation4], 256  }
  0x45   :  { %602 = vsyncadd [#allocation4], 4294967040 }
  0x46   :  { %603 = dma.done.wait [#allocation7], 2304  }
  0x47   :  { %604 = vsyncadd [#allocation7], 4294964992 }
  0x48   :  { %605 = dma.done.wait [#allocation10], 2048  }
  0x49   :  { %606 = vsyncadd [#allocation10], 4294965248  ;;  %v83_v0 = vld [vmem:[#allocation9] sm:$0xff]  ;;  %v84_v1 = vld [vmem:[#allocation9 + $0x8] sm:$0xff]  ;;  %s615_s17 = smov [#allocation11]  }
  0x4a   :  { %v188_v2 = vld [vmem:[#allocation6] sm:$0xff]  ;;  %v416_v3 = vpack.c.bf16 %v84_v1, %v83_v0  ;;  %v189_v4 = vld [vmem:[#allocation6 + $0x8] sm:$0xff]  ;;  %v190_v9 = vld [vmem:[#allocation6 + $0x10] sm:$0xff]  ;;  %s295_s18 = sshll.u32 %s615_s17, 4  ;;  %s296_s18 = int_to_ptr.vmem [resolvable:$true] %s295_s18 }
  0x4b   :  { %v85_v5 = vld [vmem:[#allocation9 + $0x10] sm:$0xff]  ;;  %v86_v6 = vld [vmem:[#allocation9 + $0x18] sm:$0xff]  ;;  %v448_v7 = vpack.c.bf16 %v189_v4, %v188_v2  ;;  %v191_v10 = vld [vmem:[#allocation6 + $0x18] sm:$0xff]  ;;  %s579_s19 = scalar_lea.vmem %s296_s18, 256  ;;  %p584_p5 = scmp.lt.s32.totalorder %s296_s18, %s296_s18 }
  0x4c   :  { %v420_v8 = vpack.c.bf16 %v86_v6, %v85_v5  ;;  %v87_v11 = vld [vmem:[#allocation9 + $0x20] sm:$0xff]  ;;  %417 = vmatprep.subr.bf16.mxu1 %v416_v3  ;;  %v452_v12 = vpack.c.bf16 %v191_v10, %v190_v9  ;;  %v88_v13 = vld [vmem:[#allocation9 + $0x28] sm:$0xff]  ;;  %v192_v14 = vld [vmem:[#allocation6 + $0x20] sm:$0xff]  ;;  %p580_p4 = scmp.ne.s32.totalorder %s296_s18, %s579_s19  ;;  %p585_p6 = scmp.lt.s32.totalorder %s579_s19, %s579_s19 }
  0x4d   :  { %v193_v15 = vld [vmem:[#allocation6 + $0x28] sm:$0xff]  ;;  %419 = vmatpush3.bf16.msra.mxu1 %v416_v3  ;;  %449 = vmatprep.subr.bf16.mxu0 %v448_v7  ;;  %v424_v16 = vpack.c.bf16 %v88_v13, %v87_v11  ;;  %v89_v18 = vld [vmem:[#allocation9 + $0x30] sm:$0xff]  ;;  %v194_v20 = vld [vmem:[#allocation6 + $0x30] sm:$0xff] }
  0x4e   :  { %451 = vmatpush3.bf16.msra.mxu0 %v448_v7  ;;  %421 = vmatprep.subr.bf16.mxu1 %v420_v8  ;;  %v456_v17 = vpack.c.bf16 %v193_v15, %v192_v14  ;;  %v90_v19 = vld [vmem:[#allocation9 + $0x38] sm:$0xff]  ;;  %v195_v21 = vld [vmem:[#allocation6 + $0x38] sm:$0xff]  ;;  %v91_v24 = vld [vmem:[#allocation9 + $0x40] sm:$0xff]  ;;  %p586_p7 = por %p585_p6, %p584_p5 }
  0x4f   :  { %453 = vmatprep.subr.bf16.mxu0 %v452_v12  ;;  %v428_v22 = vpack.c.bf16 %v90_v19, %v89_v18  ;;  %v460_v23 = vpack.c.bf16 %v195_v21, %v194_v20  ;;  %v92_v25 = vld [vmem:[#allocation9 + $0x48] sm:$0xff]  ;;  %v81_v26 = vld [vmem:[#allocation8] sm:$0xff]  ;;  %v197_v28 = vld [vmem:[#allocation6 + $0x48] sm:$0xff] }
  0x50   :  { %v196_v27 = vld [vmem:[#allocation6 + $0x40] sm:$0xff]  ;;  %378 = vmatprep.mubr.f32.mxu1 %v81_v26  ;;  %v186_v29 = vld [vmem:[#allocation3] sm:$0xff]  ;;  %v432_v30 = vpack.c.bf16 %v92_v25, %v91_v24  ;;  %v94_v33 = vld [vmem:[#allocation9 + $0x58] sm:$0xff]  ;;  %p587_p8 = pnand %p586_p7, %p580_p4 }
  0x51   :  { %423 = vmatpush3.bf16.msra.mxu1 %v420_v8  ;;  %413 = vmatprep.mubr.f32.mxu0 %v186_v29  ;;  %v464_v31 = vpack.c.bf16 %v197_v28, %v196_v27  ;;  %v93_v32 = vld [vmem:[#allocation9 + $0x50] sm:$0xff]  ;;  %v198_v34 = vld [vmem:[#allocation6 + $0x50] sm:$0xff]  ;;  %v199_v35 = vld [vmem:[#allocation6 + $0x58] sm:$0xff] }
  0x52   :  { %455 = vmatpush3.bf16.msra.mxu0 %v452_v12  ;;  %425 = vmatprep.subr.bf16.mxu1 %v424_v16  ;;  %v436_v36 = vpack.c.bf16 %v94_v33, %v93_v32  ;;  %v468_v37 = vpack.c.bf16 %v199_v35, %v198_v34  ;;  %v95_v38 = vld [vmem:[#allocation9 + $0x60] sm:$0xff]  ;;  %v96_v39 = vld [vmem:[#allocation9 + $0x68] sm:$0xff]  ;;  %v200_v40 = vld [vmem:[#allocation6 + $0x60] sm:$0xff] }
  0x53   :  { %457 = vmatprep.subr.bf16.mxu0 %v456_v17  ;;  %v201_v41 = vld [vmem:[#allocation6 + $0x68] sm:$0xff]  ;;  %v440_v42 = vpack.c.bf16 %v96_v39, %v95_v38  ;;  %v97_v44 = vld [vmem:[#allocation9 + $0x70] sm:$0xff]  ;;  %v202_v46 = vld [vmem:[#allocation6 + $0x70] sm:$0xff] }
  0x54   :  { %v472_v43 = vpack.c.bf16 %v201_v41, %v200_v40  ;;  %v98_v45 = vld [vmem:[#allocation9 + $0x78] sm:$0xff]  ;;  %v203_v47 = vld [vmem:[#allocation6 + $0x78] sm:$0xff]  ;;  %v309_v52 = vld [vmem:[%s740_s2] ss:$0 sm:$0xff] }
  0x55   :  { %427 = vmatpush3.bf16.msra.mxu1 %v424_v16  ;;  %v444_v48 = vpack.c.bf16 %v98_v45, %v97_v44  ;;  %v476_v49 = vpack.c.bf16 %v203_v47, %v202_v46  ;;  %v82_v50 = vld [vmem:[#allocation8 + $0x8] sm:$0xff]  ;;  %v187_v51 = vld [vmem:[#allocation3 + $0x8] sm:$0xff] }
  0x56   :  { %459 = vmatpush3.bf16.msra.mxu0 %v456_v17  ;;  %429 = vmatprep.subr.bf16.mxu1 %v428_v22 }
  0x57   :  { %461 = vmatprep.subr.bf16.mxu0 %v460_v23 }
  0x59   :  { %431 = vmatpush3.bf16.msra.mxu1 %v428_v22 }
  0x5a   :  { %463 = vmatpush3.bf16.msra.mxu0 %v460_v23  ;;  %433 = vmatprep.subr.bf16.mxu1 %v432_v30 }
  0x5b   :  { %465 = vmatprep.subr.bf16.mxu0 %v464_v31 }
  0x5d   :  { %435 = vmatpush3.bf16.msra.mxu1 %v432_v30 }
  0x5e   :  { %467 = vmatpush3.bf16.msra.mxu0 %v464_v31  ;;  %437 = vmatprep.subr.bf16.mxu1 %v436_v36 }
  0x5f   :  { %469 = vmatprep.subr.bf16.mxu0 %v468_v37 }
  0x61   :  { %439 = vmatpush3.bf16.msra.mxu1 %v436_v36 }
  0x62   :  { %471 = vmatpush3.bf16.msra.mxu0 %v468_v37  ;;  %441 = vmatprep.subr.bf16.mxu1 %v440_v42 }
  0x63   :  { %473 = vmatprep.subr.bf16.mxu0 %v472_v43 }
  0x65   :  { %443 = vmatpush3.bf16.msra.mxu1 %v440_v42 }
  0x66   :  { %475 = vmatpush3.bf16.msra.mxu0 %v472_v43  ;;  %445 = vmatprep.subr.bf16.mxu1 %v444_v48 }
  0x67   :  { %477 = vmatprep.subr.bf16.mxu0 %v476_v49 }
  0x69   :  { %447 = vmatpush3.bf16.msra.mxu1 %v444_v48 }
  0x6a   :  { %479 = vmatpush3.bf16.msra.mxu0 %v476_v49 }
  0x6c   :  { %379 = vmatmul.mubr.f32.vlgmr.msra.gmra.mrb[0].mxu1 %v82_v50 }
  0x6d   :  { %414 = vmatmul.mubr.f32.vlgmr.msra.gmra.mrb[0].mxu0 %v187_v51 }
 0x13f   :  { %v380_v53 = vpop.f32.mrb[0].mxu1 }
 0x140   :  { %v181_v54 = vadd.f32 %v380_v53, %v309_v52  ;;  %v165_v55 = vpop.f32.mrb[1].mxu1  ;;  %v415_v56 = vpop.f32.mrb[0].mxu0 }
 0x141   :  { %v180_v57 = vadd.f32 %v309_v52, %v165_v55  ;;  %v270_v58 = vpop.f32.mrb[1].mxu0 }
 0x142   :  { %v280_v59 = vadd.f32 %v415_v56, %v181_v54 }
 0x143   :  { %v279_v60 = vadd.f32 %v270_v58, %v180_v57 }
 0x144   :  { %289 = vst [vmem:[#allocation11 + $0x8] sm:$0xff] %v280_v59 }
 0x145   :  { %288 = vst [vmem:[#allocation11] sm:$0xff] %v279_v60 }
 0x146   :  { %590 = shalt.err (!%p587_p8)
}
 0x147   :  { %s591_s22 = scalar_lea.hbm %s743_s5, 256 }
 0x148   :  { %p592_p9 = scmp.ne.s32.totalorder %s743_s5, %s591_s22  ;;  %p595_p10 = scmp.lt.u32.totalorder %s591_s22, %s743_s5 }
 0x14a   :  { %p597_p11 = pnand %p595_p10, %p592_p9 }
 0x14c   :  { %600 = shalt.err (!%p597_p11)
}
 0x14d   :  { %301 = dma.vmem_to_hbm [thread:$0]  %s296_s18, 256, %s743_s5, [#allocation5], %s611_s30, %s611_s30, %s612_s6  }
 0x14e   :  { %607 = dma.done.wait [#allocation5], 256  }
 0x14f   :  { %608 = vsyncadd [#allocation5], 4294967040 }
 0x150   :  { %305 = vsyncpa [#allocation4], 1 }
 0x151   :  { %306 = vsyncpa [#allocation7], 1 }
 0x152   :  { %307 = vsyncpa [#allocation10], 1 }
 0x153   :  { %308 = vsyncpa [#allocation5], 1 }

</bundles_post_ra>
